<compile_context>
chip_gen: v7x
topology: tpu7x:2x2x1
jax: 0.10.0
libtpu: 0.0.40
codegen_flags: <defaults>
</compile_context>

<pallas_src>
import math

import jax
import jax.numpy as jnp
from jax import lax
from jax.experimental import pallas as pl
from jax.experimental.pallas import tpu as pltpu


_SPREAD_FAST_PATH_LIMIT = 60.0   # within-tile dynamic range allowing 1 exp/element
_NEG_FILL = -1.0e30              # finite "-inf" for masked (out-of-range) rows


def _vmem_budget_bytes():
    """Usable VMEM budget: physical capacity minus headroom, capped at 100 MiB."""
    cap = 64 << 20  # conservative fallback (v7x-sized)
    try:
        info = pltpu.get_tpu_info()
        cap_attr = getattr(info, "vmem_capacity_bytes", None)
        if cap_attr:
            cap = int(cap_attr)
    except Exception:
        pass
    return max(16 << 20, min(cap - (16 << 20), 100 << 20))


# ----------------------------------------------------------------------------
# Single-tile kernel: whole n x n matrix resident in VMEM (small n).
# ----------------------------------------------------------------------------
def _clip_loss_single_tile_kernel(scale_ref, sims_ref, out_ref):
    scale = jnp.exp(scale_ref[0, 0])
    logits = sims_ref[...].astype(jnp.float32) * scale
    n = logits.shape[0]
    inv_2n = 0.5 / jnp.float32(n)

    # diagonal (full iota mask is fine at single-tile sizes)
    rid = lax.broadcasted_iota(jnp.int32, logits.shape, 0)
    cid = lax.broadcasted_iota(jnp.int32, logits.shape, 1)
    diag_sum = jnp.sum(jnp.where(rid == cid, logits, 0.0))

    row_max = jnp.max(logits, axis=1, keepdims=True)   # (n, 1)
    col_max = jnp.max(logits, axis=0, keepdims=True)   # (1, n)
    m_all = jnp.max(row_max)                            # scalar
    use_fast = jnp.logical_and(
        m_all - jnp.min(row_max) < _SPREAD_FAST_PATH_LIMIT,
        m_all - jnp.min(col_max) < _SPREAD_FAST_PATH_LIMIT)

    @pl.when(use_fast)
    def _fast():
        # ONE exp per element, shared reference m_all (exact for bounded spread).
        p = jnp.exp(logits - m_all)
        row_lse_sum = (jnp.sum(jnp.log(jnp.sum(p, axis=1, keepdims=True)))
                       + jnp.float32(n) * m_all)
        col_lse_sum = (jnp.sum(jnp.log(jnp.sum(p, axis=0, keepdims=True)))
                       + jnp.float32(n) * m_all)
        out_ref[0, 0] = inv_2n * (row_lse_sum + col_lse_sum - 2.0 * diag_sum)

    @pl.when(jnp.logical_not(use_fast))
    def _exact():
        row_lse_sum = jnp.sum(
            jnp.log(jnp.sum(jnp.exp(logits - row_max), axis=1, keepdims=True))
            + row_max)
        col_lse_sum = jnp.sum(
            jnp.log(jnp.sum(jnp.exp(logits - col_max), axis=0, keepdims=True))
            + col_max)
        out_ref[0, 0] = inv_2n * (row_lse_sum + col_lse_sum - 2.0 * diag_sum)


# ----------------------------------------------------------------------------
# Row-tiled kernel: grid = (num_splits, blocks_per_split) over (TM, n) blocks.
# Exact per-row LSE, online (max, sum-exp) column state per split, per-split
# partial outputs merged in a tiny JAX epilogue.
# ----------------------------------------------------------------------------
def _clip_loss_tiled_kernel(scale_ref, sims_ref, diag_ref,
                            col_max_out, col_sum_out, scal_out,
                            col_max_sc, col_sum_sc, row_acc_sc, diag_acc_sc):
    c = pl.program_id(0)
    i = pl.program_id(1)
    nb = pl.num_programs(1)
    tm, n = sims_ref.shape
    has_tail = (n % tm) != 0          # static (trace-time) flag

    block = c * nb + i                 # global row-block index
    row0 = block * tm                  # first global row of this block

    scale = jnp.exp(scale_ref[0, 0])
    raw = sims_ref[...].astype(jnp.float32) * scale

    if has_tail:
        row_ids = row0 + lax.broadcasted_iota(jnp.int32, (tm, 1), 0)
        valid = row_ids < n
        tile = jnp.where(valid, raw, jnp.float32(_NEG_FILL))
    else:
        valid = None
        tile = raw

    @pl.when(i == 0)
    def _init():
        col_max_sc[...] = jnp.full((1, n), -jnp.inf, jnp.float32)
        col_sum_sc[...] = jnp.zeros((1, n), jnp.float32)
        row_acc_sc[0] = jnp.float32(0.0)
        diag_acc_sc[0] = jnp.float32(0.0)

    # ---- diagonal: only the (tm, tm) sub-block that contains it (its own
    #      BlockSpec fetches block index (block, block)) ----
    dsub = diag_ref[...].astype(jnp.float32) * scale
    rloc = lax.broadcasted_iota(jnp.int32, (tm, tm), 0)
    cloc = lax.broadcasted_iota(jnp.int32, (tm, tm), 1)
    dmask = rloc == cloc
    if has_tail:
        dmask = jnp.logical_and(dmask, (row0 + rloc) < n)
    diag_acc_sc[0] += jnp.sum(jnp.where(dmask, dsub, 0.0))

    # ---- row / column log-sum-exp ----
    row_max = jnp.max(tile, axis=1, keepdims=True)        # (tm, 1)
    tile_col_max = jnp.max(tile, axis=0, keepdims=True)   # (1, n)
    m_tile = jnp.max(row_max)                              # scalar tile max

    if has_tail:
        row_max_eff = jnp.where(valid, row_max, m_tile)
    else:
        row_max_eff = row_max
    use_fast = jnp.logical_and(
        m_tile - jnp.min(row_max_eff) < _SPREAD_FAST_PATH_LIMIT,
        m_tile - jnp.min(tile_col_max) < _SPREAD_FAST_PATH_LIMIT)

    old_max = col_max_sc[...]
    new_max = jnp.maximum(old_max, tile_col_max)
    carry = jnp.exp(old_max - new_max)    # (1, n); exp(-inf)=0 on the first block

    @pl.when(use_fast)
    def _fast():
        # ONE exp per element; row LSE and column partial share the reference.
        p = jnp.exp(tile - m_tile)
        row_lse = jnp.log(jnp.sum(p, axis=1, keepdims=True)) + m_tile
        if has_tail:
            row_lse = jnp.where(valid, row_lse, 0.0)
        row_acc_sc[0] += jnp.sum(row_lse)
        col_part = jnp.sum(p, axis=0, keepdims=True)       # referenced to m_tile
        col_sum_sc[...] = (col_sum_sc[...] * carry
                           + col_part * jnp.exp(m_tile - new_max))

    @pl.when(jnp.logical_not(use_fast))
    def _exact():
        # Wide dynamic range: exact 2-exp scheme (no overflow for any input).
        row_lse = (jnp.log(jnp.sum(jnp.exp(tile - row_max), axis=1, keepdims=True))
                   + row_max)
        if has_tail:
            row_lse = jnp.where(valid, row_lse, 0.0)
        row_acc_sc[0] += jnp.sum(row_lse)
        col_sum_sc[...] = (col_sum_sc[...] * carry
                           + jnp.sum(jnp.exp(tile - new_max), axis=0, keepdims=True))

    col_max_sc[...] = new_max

    @pl.when(i == nb - 1)
    def _finalize():
        col_max_out[...] = jnp.broadcast_to(col_max_sc[...], col_max_out.shape)
        col_sum_out[...] = jnp.broadcast_to(col_sum_sc[...], col_sum_out.shape)
        lane = lax.broadcasted_iota(jnp.int32, scal_out.shape, 1)
        scal_out[...] = jnp.where(lane == 0, row_acc_sc[0],
                                  jnp.where(lane == 1, diag_acc_sc[0], 0.0))


def _tiled_clip_loss(sims, scale, block_rows, num_splits, budget):
    n = sims.shape[0]
    itemsize = jnp.dtype(sims.dtype).itemsize

    if block_rows is None:
        # Per row of a block: 2x double-buffered input + ~3 live f32 temporaries.
        per_row = n * (2 * itemsize + 12)
        est = (budget - (4 << 20)) // max(per_row, 1)
        block_rows = min(1024, max(128, (est // 128) * 128))
    block_rows = max(128, (int(block_rows) // 128) * 128)
    block_rows = min(block_rows, max(128, (n // 128) * 128))

    nb_total = -(-n // block_rows)
    if num_splits is None:
        num_splits = 2 if (nb_total >= 2 and nb_total % 2 == 0) else 1
    if num_splits < 1 or nb_total % num_splits != 0:
        num_splits = 1
    nb = nb_total // num_splits

    grid = (num_splits, nb)
    row_block_map = lambda c, i: (c * nb + i, 0)
    diag_block_map = lambda c, i: (c * nb + i, c * nb + i)

    out_shape = (
        jax.ShapeDtypeStruct((num_splits * 8, n), jnp.float32),    # col max partials
        jax.ShapeDtypeStruct((num_splits * 8, n), jnp.float32),    # col sum partials
        jax.ShapeDtypeStruct((num_splits * 8, 128), jnp.float32),  # [row_acc, diag_acc]
    )
    grid_spec = pltpu.PrefetchScalarGridSpec(
        num_scalar_prefetch=0,
        grid=grid,
        in_specs=[
            pl.BlockSpec(memory_space=pltpu.SMEM),                       # logit_scale
            pl.BlockSpec((block_rows, n), row_block_map),                # row block
            pl.BlockSpec((block_rows, block_rows), diag_block_map),      # diag block
        ],
        out_specs=[
            pl.BlockSpec((8, n), lambda c, i: (c, 0)),
            pl.BlockSpec((8, n), lambda c, i: (c, 0)),
            pl.BlockSpec((8, 128), lambda c, i: (c, 0)),
        ],
        scratch_shapes=[
            pltpu.VMEM((1, n), jnp.float32),   # running column max
            pltpu.VMEM((1, n), jnp.float32),   # running column sum-exp
            pltpu.SMEM((1,), jnp.float32),     # sum of row LSEs
            pltpu.SMEM((1,), jnp.float32),     # sum of diagonal logits
        ])

    col_max_p, col_sum_p, scal_p = pl.pallas_call(
        _clip_loss_tiled_kernel,
        out_shape=out_shape,
        grid_spec=grid_spec,
        compiler_params=pltpu.CompilerParams(
            dimension_semantics=("parallel", "arbitrary"),
            vmem_limit_bytes=int(budget)),
    )(scale, sims, sims)

    # Tiny epilogue: merge the per-split column-LSE state and scalar partials.
    cm = col_max_p[0::8, :]
    cs = col_sum_p[0::8, :]
    sc = scal_p[0::8, :]
    m = jnp.max(cm, axis=0, keepdims=True)
    col_total = jnp.sum(jnp.log(jnp.sum(cs * jnp.exp(cm - m), axis=0)) + m[0])
    row_total = jnp.sum(sc[:, 0])
    diag_total = jnp.sum(sc[:, 1])
    return (row_total + col_total - 2.0 * diag_total) / (2.0 * jnp.float32(n))


# ----------------------------------------------------------------------------
# Wrapper
# ----------------------------------------------------------------------------
def clip_loss(sims, logit_scale, *, block_rows=None, single_tile_max_n=None,
              num_splits=None):
    """sims: [n, n] (f32 or bf16), logit_scale: scalar / [1,1] -> f32 scalar loss."""
    n = sims.shape[0]
    assert sims.ndim == 2 and sims.shape == (n, n)
    scale = jnp.asarray(logit_scale, dtype=jnp.float32).reshape(1, 1)
    budget = _vmem_budget_bytes()
    itemsize = jnp.dtype(sims.dtype).itemsize

    if single_tile_max_n is None:
        # input + ~handful of live f32 temporaries must fit the budget.
        per_elem = itemsize + 28
        fit_n = int(math.isqrt(max(budget - (2 << 20), 1) // per_elem))
        single_tile_max_n = max(128,
                                min(fit_n, 1536 if budget >= (80 << 20) else 1024))

    if n <= single_tile_max_n or n < 128:
        out = pl.pallas_call(
            _clip_loss_single_tile_kernel,
            out_shape=jax.ShapeDtypeStruct((1, 1), jnp.float32),
            in_specs=[
                pl.BlockSpec(memory_space=pltpu.SMEM),   # logit_scale scalar
                pl.BlockSpec(memory_space=pltpu.VMEM),   # whole sims matrix
            ],
            out_specs=pl.BlockSpec(memory_space=pltpu.SMEM),
            compiler_params=pltpu.CompilerParams(vmem_limit_bytes=int(budget)),
        )(scale, sims)
        return out[0, 0]

    return _tiled_clip_loss(sims, scale, block_rows, num_splits, budget)


def clip_loss_ref(sims, logit_scale):
    """Pure-JAX reference matching the PyTorch module exactly."""
    logits = sims.astype(jnp.float32) * jnp.exp(
        jnp.asarray(logit_scale, jnp.float32).reshape(1, 1)[0, 0])
    t2v = jax.nn.log_softmax(logits, axis=1)
    v2t = jax.nn.log_softmax(logits, axis=0)
    return (-jnp.mean(jnp.diag(t2v)) - jnp.mean(jnp.diag(v2t))) / 2.0


if __name__ == "__main__":
    key = jax.random.PRNGKey(0)
    ks = jax.random.split(key, 6)

    # CLIP's standard init for logit_scale: log(1 / 0.07)
    logit_scale = jnp.full((1, 1), jnp.log(1.0 / 0.07), dtype=jnp.float32)

    def check(sims, ls, tol, **kw):
        got = jax.block_until_ready(clip_loss(sims, ls, **kw))
        ref = jax.block_until_ready(clip_loss_ref(sims, ls))
        assert jnp.allclose(got, ref, rtol=tol, atol=tol), (got, ref)

    # 1) tiny batch -> single-tile path (fast branch)
    check(jnp.tanh(jax.random.normal(ks[0], (8, 8), jnp.float32)), logit_scale, 1e-5)

    # 2) tiled path, 2 splits x 1 block, f32
    s256 = jnp.tanh(jax.random.normal(ks[1], (256, 256), jnp.float32))
    check(s256, logit_scale, 5e-4, block_rows=128, single_tile_max_n=128)

    # 3) bf16 sims straight from HBM (half the DMA bytes), tiled path
    check(s256.astype(jnp.bfloat16), logit_scale, 5e-4,
          block_rows=128, single_tile_max_n=128)

    # 4) n not divisible by block_rows -> masked tail block
    s200 = jnp.tanh(jax.random.normal(ks[2], (200, 200), jnp.float32))
    check(s200, logit_scale, 5e-4, block_rows=128, single_tile_max_n=128)

    # 5) odd number of blocks -> single split, multi-block online column LSE
    s384 = jnp.tanh(jax.random.normal(ks[3], (384, 384), jnp.float32))
    check(s384, logit_scale, 5e-4, block_rows=128, single_tile_max_n=128)

    # 6) 2 splits x 2 blocks
    s512 = jnp.tanh(jax.random.normal(ks[4], (512, 512), jnp.float32))
    check(s512, logit_scale, 5e-4, block_rows=128, single_tile_max_n=128)

    # 7) very large logit_scale -> wide dynamic range -> exact (2-exp) branch
    big_scale = jnp.full((1, 1), jnp.log(100.0), dtype=jnp.float32)
    check(s256, big_scale, 2e-3, block_rows=128, single_tile_max_n=128)
    check(jnp.tanh(jax.random.normal(ks[5], (64, 64), jnp.float32)), big_scale, 2e-3)

    print("KERNEL_OK")
</pallas_src>

<mosaic_0001>
module attributes {stable_mosaic.version = 11 : i64} {
  func.func @_clip_loss_single_tile_kernel(%arg0: memref<1x1xf32, #tpu.memory_space<smem>>, %arg1: memref<8x8xf32, #tpu.memory_space<vmem>>, %arg2: memref<1x1xf32, #tpu.memory_space<smem>>) attributes {dimension_semantics = [], scalar_prefetch = 0 : i64, scratch_operands = 0 : i64, tpu.core_type = #tpu.core_type<tc>} {
    %c0 = arith.constant 0 : index
    %c0_0 = arith.constant 0 : index
    %0 = memref.load %arg0[%c0, %c0_0] : memref<1x1xf32, #tpu.memory_space<smem>>
    %1 = math.exp %0 : f32
    %c0_1 = arith.constant 0 : index
    %c0_2 = arith.constant 0 : index
    %2 = vector.load %arg1[%c0_1, %c0_2] : memref<8x8xf32, #tpu.memory_space<vmem>>, vector<8x8xf32>
    %3 = vector.broadcast %1 : f32 to vector<8x8xf32>
    %4 = arith.mulf %2, %3 : vector<8x8xf32>
    %cst = arith.constant 5.000000e-01 : f32
    %cst_3 = arith.constant 8.000000e+00 : f32
    %5 = arith.divf %cst, %cst_3 : f32
    %6 = tpu.iota {dimensions = array<i32: 0>} : vector<8x8xi32>
    %7 = tpu.iota {dimensions = array<i32: 1>} : vector<8x8xi32>
    %8 = arith.cmpi eq, %6, %7 : vector<8x8xi32>
    %cst_4 = arith.constant 0.000000e+00 : f32
    %9 = vector.broadcast %cst_4 : f32 to vector<8x8xf32>
    %10 = arith.select %8, %4, %9 : vector<8x8xi1>, vector<8x8xf32>
    %11 = vector.shape_cast %10 : vector<8x8xf32> to vector<1x8x8xf32>
    %cst_5 = arith.constant dense<0.000000e+00> : vector<1xf32>
    %12 = vector.multi_reduction <add>, %11, %cst_5 [1, 2] : vector<1x8x8xf32> to vector<1xf32>
    %13 = vector.shape_cast %12 : vector<1xf32> to vector<1x1x1xf32>
    %14 = vector.extract %13[0, 0, 0] : f32 from vector<1x1x1xf32>
    %cst_6 = arith.constant dense<0xFF800000> : vector<8xf32>
    %15 = vector.multi_reduction <maximumf>, %4, %cst_6 [1] : vector<8x8xf32> to vector<8xf32>
    %16 = vector.shape_cast %15 : vector<8xf32> to vector<8x1xf32>
    %cst_7 = arith.constant dense<0xFF800000> : vector<8xf32>
    %17 = vector.multi_reduction <maximumf>, %4, %cst_7 [0] : vector<8x8xf32> to vector<8xf32>
    %18 = vector.shape_cast %17 : vector<8xf32> to vector<1x8xf32>
    %19 = vector.shape_cast %16 : vector<8x1xf32> to vector<1x8x1xf32>
    %cst_8 = arith.constant dense<0xFF800000> : vector<1xf32>
    %20 = vector.multi_reduction <maximumf>, %19, %cst_8 [1, 2] : vector<1x8x1xf32> to vector<1xf32>
    %21 = vector.shape_cast %20 : vector<1xf32> to vector<1x1x1xf32>
    %22 = vector.extract %21[0, 0, 0] : f32 from vector<1x1x1xf32>
    %23 = vector.shape_cast %16 : vector<8x1xf32> to vector<1x8x1xf32>
    %cst_9 = arith.constant dense<0x7F800000> : vector<1xf32>
    %24 = vector.multi_reduction <minimumf>, %23, %cst_9 [1, 2] : vector<1x8x1xf32> to vector<1xf32>
    %25 = vector.shape_cast %24 : vector<1xf32> to vector<1x1x1xf32>
    %26 = vector.extract %25[0, 0, 0] : f32 from vector<1x1x1xf32>
    %27 = arith.subf %22, %26 : f32
    %cst_10 = arith.constant 6.000000e+01 : f32
    %28 = arith.cmpf olt, %27, %cst_10 : f32
    %29 = vector.shape_cast %18 : vector<1x8xf32> to vector<1x1x8xf32>
    %cst_11 = arith.constant dense<0x7F800000> : vector<1xf32>
    %30 = vector.multi_reduction <minimumf>, %29, %cst_11 [1, 2] : vector<1x1x8xf32> to vector<1xf32>
    %31 = vector.shape_cast %30 : vector<1xf32> to vector<1x1x1xf32>
    %32 = vector.extract %31[0, 0, 0] : f32 from vector<1x1x1xf32>
    %33 = arith.subf %22, %32 : f32
    %cst_12 = arith.constant 6.000000e+01 : f32
    %34 = arith.cmpf olt, %33, %cst_12 : f32
    %35 = arith.andi %28, %34 : i1
    %36 = arith.extui %35 : i1 to i32
    %c0_i32 = arith.constant 0 : i32
    %37 = arith.cmpi ne, %36, %c0_i32 : i32
    scf.if %37 {
      %41 = vector.broadcast %22 : f32 to vector<8x8xf32>
      %42 = arith.subf %4, %41 : vector<8x8xf32>
      %43 = math.exp %42 : vector<8x8xf32>
      %cst_14 = arith.constant dense<0.000000e+00> : vector<8xf32>
      %44 = vector.multi_reduction <add>, %43, %cst_14 [1] : vector<8x8xf32> to vector<8xf32>
      %45 = vector.shape_cast %44 : vector<8xf32> to vector<8x1xf32>
      %46 = math.log %45 : vector<8x1xf32>
      %47 = vector.shape_cast %46 : vector<8x1xf32> to vector<1x8x1xf32>
      %cst_15 = arith.constant dense<0.000000e+00> : vector<1xf32>
      %48 = vector.multi_reduction <add>, %47, %cst_15 [1, 2] : vector<1x8x1xf32> to vector<1xf32>
      %49 = vector.shape_cast %48 : vector<1xf32> to vector<1x1x1xf32>
      %50 = vector.extract %49[0, 0, 0] : f32 from vector<1x1x1xf32>
      %cst_16 = arith.constant 8.000000e+00 : f32
      %51 = arith.mulf %cst_16, %22 : f32
      %52 = arith.addf %50, %51 : f32
      %cst_17 = arith.constant dense<0.000000e+00> : vector<8xf32>
      %53 = vector.multi_reduction <add>, %43, %cst_17 [0] : vector<8x8xf32> to vector<8xf32>
      %54 = vector.shape_cast %53 : vector<8xf32> to vector<1x8xf32>
      %55 = math.log %54 : vector<1x8xf32>
      %56 = vector.shape_cast %55 : vector<1x8xf32> to vector<1x1x8xf32>
      %cst_18 = arith.constant dense<0.000000e+00> : vector<1xf32>
      %57 = vector.multi_reduction <add>, %56, %cst_18 [1, 2] : vector<1x1x8xf32> to vector<1xf32>
      %58 = vector.shape_cast %57 : vector<1xf32> to vector<1x1x1xf32>
      %59 = vector.extract %58[0, 0, 0] : f32 from vector<1x1x1xf32>
      %cst_19 = arith.constant 8.000000e+00 : f32
      %60 = arith.mulf %cst_19, %22 : f32
      %61 = arith.addf %59, %60 : f32
      %62 = arith.addf %52, %61 : f32
      %cst_20 = arith.constant 2.000000e+00 : f32
      %63 = arith.mulf %cst_20, %14 : f32
      %64 = arith.subf %62, %63 : f32
      %65 = arith.mulf %5, %64 : f32
      %c0_21 = arith.constant 0 : index
      %c0_22 = arith.constant 0 : index
      %66 = memref.load %arg2[%c0_21, %c0_22] : memref<1x1xf32, #tpu.memory_space<smem>>
      memref.store %65, %arg2[%c0_21, %c0_22] : memref<1x1xf32, #tpu.memory_space<smem>>
    } else {
    }
    %true = arith.constant true
    %38 = arith.xori %35, %true : i1
    %39 = arith.extui %38 : i1 to i32
    %c0_i32_13 = arith.constant 0 : i32
    %40 = arith.cmpi ne, %39, %c0_i32_13 : i32
    scf.if %40 {
      %41 = vector.broadcast %16 : vector<8x1xf32> to vector<8x8xf32>
      %42 = arith.subf %4, %41 : vector<8x8xf32>
      %43 = math.exp %42 : vector<8x8xf32>
      %cst_14 = arith.constant dense<0.000000e+00> : vector<8xf32>
      %44 = vector.multi_reduction <add>, %43, %cst_14 [1] : vector<8x8xf32> to vector<8xf32>
      %45 = vector.shape_cast %44 : vector<8xf32> to vector<8x1xf32>
      %46 = math.log %45 : vector<8x1xf32>
      %47 = arith.addf %46, %16 : vector<8x1xf32>
      %48 = vector.shape_cast %47 : vector<8x1xf32> to vector<1x8x1xf32>
      %cst_15 = arith.constant dense<0.000000e+00> : vector<1xf32>
      %49 = vector.multi_reduction <add>, %48, %cst_15 [1, 2] : vector<1x8x1xf32> to vector<1xf32>
      %50 = vector.shape_cast %49 : vector<1xf32> to vector<1x1x1xf32>
      %51 = vector.extract %50[0, 0, 0] : f32 from vector<1x1x1xf32>
      %52 = vector.broadcast %18 : vector<1x8xf32> to vector<8x8xf32>
      %53 = arith.subf %4, %52 : vector<8x8xf32>
      %54 = math.exp %53 : vector<8x8xf32>
      %cst_16 = arith.constant dense<0.000000e+00> : vector<8xf32>
      %55 = vector.multi_reduction <add>, %54, %cst_16 [0] : vector<8x8xf32> to vector<8xf32>
      %56 = vector.shape_cast %55 : vector<8xf32> to vector<1x8xf32>
      %57 = math.log %56 : vector<1x8xf32>
      %58 = arith.addf %57, %18 : vector<1x8xf32>
      %59 = vector.shape_cast %58 : vector<1x8xf32> to vector<1x1x8xf32>
      %cst_17 = arith.constant dense<0.000000e+00> : vector<1xf32>
      %60 = vector.multi_reduction <add>, %59, %cst_17 [1, 2] : vector<1x1x8xf32> to vector<1xf32>
      %61 = vector.shape_cast %60 : vector<1xf32> to vector<1x1x1xf32>
      %62 = vector.extract %61[0, 0, 0] : f32 from vector<1x1x1xf32>
      %63 = arith.addf %51, %62 : f32
      %cst_18 = arith.constant 2.000000e+00 : f32
      %64 = arith.mulf %cst_18, %14 : f32
      %65 = arith.subf %63, %64 : f32
      %66 = arith.mulf %5, %65 : f32
      %c0_19 = arith.constant 0 : index
      %c0_20 = arith.constant 0 : index
      %67 = memref.load %arg2[%c0_19, %c0_20] : memref<1x1xf32, #tpu.memory_space<smem>>
      memref.store %66, %arg2[%c0_19, %c0_20] : memref<1x1xf32, #tpu.memory_space<smem>>
    } else {
    }
    return
  }
}

</mosaic_0001>

<bundles_post_ra>
// kernel: tpu_custom_call.1
= control target key start
LH: loop header
LB: loop body
LE: loop exit
PB: predicated region body
PF: predicated region fallthrough
CT: control target
= control target key end

     0   :  { %8 = vsyncpa [#allocation4], 0  ;;  %s373_s0 = inlined_call_operand.<no memory space> [shape: f32[1,1], index: 0, kind: input, shape index: {}]   ;;  %s374_s1 = inlined_call_operand.hbm [shape: f32[8,8], index: 1, kind: input, shape index: {}]   ;;  %s375_s2 = inlined_call_operand.hbm [shape: f32[1,1], index: 2, kind: output, shape index: {}]  }
   0x1   :  { %9 = vsyncpa [#allocation5], 0  ;;  %s272_s9 = smov [#allocation3]   ;;  %s236_s13 = scalar_lea.hbm %s374_s1, 128 }
   0x2   :  { %s18_s10 = sshll.u32 %s272_s9, 4  ;;  %p237_p0 = scmp.ne.s32.totalorder %s374_s1, %s236_s13  ;;  %s19_s10 = int_to_ptr.vmem [resolvable:$true] %s18_s10 }
   0x3   :  { %p240_p1 = scmp.lt.u32.totalorder %s236_s13, %s374_s1 }
   0x5   :  { %p242_p2 = pnand %p240_p1, %p237_p0 }
   0x7   :  { %245 = shalt.err (!%p242_p2)
}
   0x8   :  { %s246_s18 = scalar_lea.vmem %s19_s10, 128  ;;  %p251_p4 = scmp.lt.s32.totalorder %s19_s10, %s19_s10 }
   0x9   :  { %p247_p3 = scmp.ne.s32.totalorder %s19_s10, %s246_s18  ;;  %p252_p5 = scmp.lt.s32.totalorder %s246_s18, %s246_s18 }
   0xb   :  { %p253_p6 = por %p252_p5, %p251_p4 }
   0xd   :  { %p254_p7 = pnand %p253_p6, %p247_p3 }
   0xf   :  { %257 = shalt.err (!%p254_p7)
}
  0x10   :  { %21 = dma.hbm_to_vmem [thread:$0]  %s374_s1, 128, %s19_s10, [#allocation4]   ;;  %v26_v0 = vstv %s373_s0 }
  0x11   :  { %268 = dma.done.wait [#allocation4], 128  }
  0x12   :  { %269 = vsyncadd [#allocation4], 4294967168  ;;  %v27_v1 = vmul.f32 1.442695, %v26_v0  ;;  %v33_v3 = vlaneseq  ;;  %v30_v6 = vld [vmem:[#allocation3] sm:$0xff]  ;;  %vm39_vm1 = vcmask 64512  }
  0x14   :  { %220 = vpow2.f32 %v27_v1  ;;  %v34_v4 = vshrl.u32 %v33_v3, 7  ;;  %v36_v5 = vand.u32 127, %v33_v3 }
  0x16   :  { %vm37_vm0 = vcmp.eq.s32.totalorder %v34_v4, %v36_v5 }
  0x1e   :  { %v221_v2 = vpop.eup %220 }
  0x1f   :  { %200 = vpush %v221_v2 }
  0x50   :  { %s201_s23 = spop %200 }
  0x51   :  { %v31_v7 = vstv %s201_s23 }
  0x52   :  { %v304_v8 = vmul.f32 %v31_v7, %v30_v6 }
  0x54   :  { %v38_v9 = vsel %vm37_vm0, %v304_v8, 0.0  ;;  %v50_v10 = vsel %vm39_vm1, %v304_v8, -inf }
  0x55   :  { %v40_v11 = vsel %vm39_vm1, %v38_v9, 0.0  ;;  %v53_v12 = vrot.slane %v50_v10, 4 }
  0x56   :  { %41 = vadd.xlane.f32.xlu0 %v40_v11 }
  0x57   :  { %v54_v13 = vmax.f32 %v50_v10, %v53_v12 }
  0x59   :  { %v55_v14 = vrot.slane %v54_v13, 2 }
  0x5a   :  { %51 = vmax.xlane.f32.xlu0 %v50_v10 }
  0x5b   :  { %v56_v15 = vmax.f32 %v54_v13, %v55_v14 }
  0x5d   :  { %v57_v16 = vrot.slane %v56_v15, 1 }
  0x5f   :  { %v310_v17 = vmax.f32 %v56_v15, %v57_v16 }
  0x61   :  { %v75_v18 = vsel %vm39_vm1, %v310_v17, inf }
  0x62   :  { %76 = vmin.xlane.f32.xlu1 %v75_v18 }
  0xe3   :  { %v42_v19 = vpop.xlane.xlu0 %41 }
  0xe4   :  { %v43_v20 = vrot.slane %v42_v19, 4 }
  0xe6   :  { %v44_v21 = vadd.f32 %v43_v20, %v42_v19 }
  0xe7   :  { %v314_v22 = vpop.xlane.xlu0 %51 }
  0xe8   :  { %v45_v23 = vrot.slane %v44_v21, 2  ;;  %v59_v24 = vrot.slane %v314_v22, 4 }
  0xea   :  { %v60_v25 = vmax.f32 %v314_v22, %v59_v24  ;;  %v67_v26 = vmin.f32 %v314_v22, %v59_v24  ;;  %v46_v27 = vadd.f32 %v45_v23, %v44_v21 }
  0xec   :  { %v61_v28 = vrot.slane %v60_v25, 2  ;;  %v68_v29 = vrot.slane %v67_v26, 2  ;;  %v47_v30 = vrot.slane %v46_v27, 1 }
  0xee   :  { %v48_v31 = vadd.f32 %v47_v30, %v46_v27  ;;  %v62_v32 = vmax.f32 %v60_v25, %v61_v28  ;;  %v69_v33 = vmin.f32 %v67_v26, %v68_v29 }
  0xef   :  { %v77_v38 = vpop.xlane.xlu1 %76 }
  0xf0   :  { %202 = vpush %v48_v31  ;;  %v63_v34 = vrot.slane %v62_v32, 1  ;;  %v70_v35 = vrot.slane %v69_v33, 1 }
  0xf2   :  { %v64_v36 = vmax.f32 %v62_v32, %v63_v34  ;;  %v71_v37 = vmin.f32 %v69_v33, %v70_v35 }
  0xf4   :  { %204 = vpush %v64_v36 }
  0xf5   :  { %206 = vpush %v71_v37 }
  0xf6   :  { %208 = vpush %v77_v38 }
 0x121   :  { %s319_s0 = spop %202 }
 0x125   :  { %s321_s1 = spop %204 }
 0x126   :  { %s207_s24 = spop %206 }
 0x127   :  { %s73_s25 = ssub.f32 %s321_s1, %s207_s24  ;;  %s209_s26 = spop %208 }
 0x128   :  { %s79_s27 = ssub.f32 %s321_s1, %s209_s26 }
 0x129   :  { %p325_p8 = scmp.lt.f32.partialorder %s73_s25, 60.0 }
 0x12a   :  { %p329_p9 = scmp.lt.f32.partialorder %s79_s27, 60.0 }
 0x12c   :  { %p81_p10 = pnand %p329_p9, %p325_p8 }
 0x12d   :  { %v85_v39 = vstv (!%p81_p10), %s321_s1  ;;  %vm115_vm2 = vcmask (!%p81_p10), 57344   ;;  %vm94_vm3 = vcmask (!%p81_p10), 7168   ;;  %s105_s30 = smul.f32 (!%p81_p10), 8.0, %s321_s1 }
 0x12e   :  { %84 = sbr.rel (%p81_p10) target bundleno = 688 (0x2b0), region = 17  ;;  %v86_v40 = vsub.f32 (!%p81_p10), %v304_v8, %v85_v39 }
 0x12f   :  { %s128_s7 = smul.f32 (!%p81_p10), 2.0, %s319_s0 }
 0x130   :  { %v87_v41 = vmul.f32 (!%p81_p10), 1.442695, %v86_v40 }
 0x132   :  { %222 = vpow2.f32 (!%p81_p10), %v87_v41 }
 0x13c   :  { %v223_v42 = vpop.eup %222 }
 0x13d   :  { %v89_v43 = vsel %vm39_vm1, %v223_v42, 0.0 }
 0x13e   :  { %90 = vadd.xlane.f32.xlu0 %v89_v43  ;;  %v107_v44 = vrot.slane %v89_v43, 4 }
 0x140   :  { %v108_v45 = vadd.f32 %v107_v44, %v89_v43 }
 0x142   :  { %v109_v46 = vrot.slane %v108_v45, 2 }
 0x144   :  { %v110_v47 = vadd.f32 %v109_v46, %v108_v45 }
 0x146   :  { %v111_v48 = vrot.slane %v110_v47, 1 }
 0x148   :  { %v112_v49 = vadd.f32 %v111_v48, %v110_v47 }
 0x14a   :  { %224 = vlog2.f32 %v112_v49 }
 0x154   :  { %v225_v50 = vpop.eup %224 }
 0x155   :  { %v114_v51 = vmul.f32 0.6931472, %v225_v50 }
 0x157   :  { %v116_v52 = vsel %vm115_vm2, %v114_v51, 0.0 }
 0x158   :  { %117 = vadd.xlane.f32.xlu1 %v116_v52 }
 0x1cb   :  { %v91_v53 = vpop.xlane.xlu0 %90 }
 0x1cc   :  { %226 = vlog2.f32 %v91_v53 }
 0x1d6   :  { %v227_v54 = vpop.eup %226 }
 0x1d7   :  { %v93_v55 = vmul.f32 0.6931472, %v227_v54 }
 0x1d9   :  { %v95_v56 = vsel %vm94_vm3, %v93_v55, 0.0 }
 0x1da   :  { %96 = vadd.xlane.f32.xlu0 %v95_v56 }
 0x1e5   :  { %v118_v57 = vpop.xlane.xlu1 %117 }
 0x1e6   :  { %v119_v58 = vrot.slane %v118_v57, 4 }
 0x1e8   :  { %v120_v59 = vadd.f32 %v119_v58, %v118_v57 }
 0x1ea   :  { %v121_v60 = vrot.slane %v120_v59, 2 }
 0x1ec   :  { %v122_v0 = vadd.f32 %v121_v60, %v120_v59 }
 0x1ee   :  { %v123_v3 = vrot.slane %v122_v0, 1 }
 0x1f0   :  { %v124_v6 = vadd.f32 %v123_v3, %v122_v0 }
 0x267   :  { %v97_v61 = vpop.xlane.xlu0 %96 }
 0x268   :  { %v98_v62 = vrot.slane %v97_v61, 4 }
 0x26a   :  { %v99_v63 = vadd.f32 %v98_v62, %v97_v61 }
 0x26c   :  { %v100_v1 = vrot.slane %v99_v63, 2 }
 0x26e   :  { %v101_v2 = vadd.f32 %v100_v1, %v99_v63 }
 0x270   :  { %v102_v4 = vrot.slane %v101_v2, 1 }
 0x272   :  { %v103_v5 = vadd.f32 %v102_v4, %v101_v2 }
 0x274   :  { %210 = vpush %v103_v5 }
 0x275   :  { %212 = vpush %v124_v6 }
 0x2a5   :  { %s211_s3 = spop %210 }
 0x2a6   :  { %s106_s4 = sadd.f32 %s211_s3, %s105_s30  ;;  %s213_s5 = spop %212 }
 0x2a7   :  { %s126_s6 = sadd.f32 %s213_s5, %s105_s30 }
 0x2a9   :  { %s127_s8 = sadd.f32 %s126_s6, %s106_s4 }
 0x2ab   :  { %s129_s9 = ssub.f32 %s127_s8, %s128_s7 }
 0x2ad   :  { %s130_s10 = smul.f32 0.0625, %s129_s9 }
 0x2af   :  { %132 = sst [smem:[#allocation6]] %s130_s10 }
 0x2b0 PF:  { %135 = sbr.rel (!%p81_p10) target bundleno = 1074 (0x432), region = 21  ;;  %v136_v7 = vsub.f32 (%p81_p10), %v304_v8, %v314_v22  ;;  %v156_v9 = vsub.f32 (%p81_p10), %v304_v8, %v310_v17  ;;  %vm169_vm4 = vcmask (%p81_p10), 57344   ;;  %vm145_vm5 = vcmask (%p81_p10), 7168  }
 0x2b1   :  { %s181_s12 = smul.f32 (%p81_p10), 2.0, %s319_s0 }
 0x2b2   :  { %v137_v10 = vmul.f32 (%p81_p10), 1.442695, %v136_v7  ;;  %v157_v11 = vmul.f32 (%p81_p10), 1.442695, %v156_v9 }
 0x2b4   :  { %228 = vpow2.f32 (%p81_p10), %v137_v10 }
 0x2b5   :  { %230 = vpow2.f32 (%p81_p10), %v157_v11 }
 0x2be   :  { %v229_v12 = vpop.eup %228 }
 0x2bf   :  { %v231_v13 = vpop.eup %230  ;;  %v139_v14 = vsel %vm39_vm1, %v229_v12, 0.0 }
 0x2c0   :  { %140 = vadd.xlane.f32.xlu0 %v139_v14  ;;  %v159_v15 = vsel %vm39_vm1, %v231_v13, 0.0 }
 0x2c1   :  { %v160_v16 = vrot.slane %v159_v15, 4 }
 0x2c3   :  { %v161_v18 = vadd.f32 %v160_v16, %v159_v15 }
 0x2c5   :  { %v162_v19 = vrot.slane %v161_v18, 2 }
 0x2c7   :  { %v163_v20 = vadd.f32 %v162_v19, %v161_v18 }
 0x2c9   :  { %v164_v21 = vrot.slane %v163_v20, 1 }
 0x2cb   :  { %v165_v23 = vadd.f32 %v164_v21, %v163_v20 }
 0x2cd   :  { %232 = vlog2.f32 %v165_v23 }
 0x2d7   :  { %v233_v24 = vpop.eup %232 }
 0x2d8   :  { %v167_v8 = vmul.f32 0.6931472, %v233_v24 }
 0x2da   :  { %v168_v25 = vadd.f32 %v167_v8, %v310_v17 }
 0x2dc   :  { %v170_v26 = vsel %vm169_vm4, %v168_v25, 0.0 }
 0x2dd   :  { %171 = vadd.xlane.f32.xlu1 %v170_v26 }
 0x34d   :  { %v141_v27 = vpop.xlane.xlu0 %140 }
 0x34e   :  { %234 = vlog2.f32 %v141_v27 }
 0x358   :  { %v235_v28 = vpop.eup %234 }
 0x359   :  { %v143_v29 = vmul.f32 0.6931472, %v235_v28 }
 0x35b   :  { %v144_v30 = vadd.f32 %v143_v29, %v314_v22 }
 0x35d   :  { %v146_v31 = vsel %vm145_vm5, %v144_v30, 0.0 }
 0x35e   :  { %147 = vadd.xlane.f32.xlu0 %v146_v31 }
 0x36a   :  { %v172_v32 = vpop.xlane.xlu1 %171 }
 0x36b   :  { %v173_v33 = vrot.slane %v172_v32, 4 }
 0x36d   :  { %v174_v34 = vadd.f32 %v173_v33, %v172_v32 }
 0x36f   :  { %v175_v35 = vrot.slane %v174_v34, 2 }
 0x371   :  { %v176_v17 = vadd.f32 %v175_v35, %v174_v34 }
 0x373   :  { %v177_v41 = vrot.slane %v176_v17, 1 }
 0x375   :  { %v178_v44 = vadd.f32 %v177_v41, %v176_v17 }
 0x3eb   :  { %v148_v36 = vpop.xlane.xlu0 %147 }
 0x3ec   :  { %v149_v37 = vrot.slane %v148_v36, 4 }
 0x3ee   :  { %v150_v38 = vadd.f32 %v149_v37, %v148_v36 }
 0x3f0   :  { %v151_v39 = vrot.slane %v150_v38, 2 }
 0x3f2   :  { %v152_v40 = vadd.f32 %v151_v39, %v150_v38 }
 0x3f4   :  { %v153_v42 = vrot.slane %v152_v40, 1 }
 0x3f6   :  { %v154_v43 = vadd.f32 %v153_v42, %v152_v40 }
 0x3f8   :  { %214 = vpush %v154_v43 }
 0x3f9   :  { %216 = vpush %v178_v44 }
 0x429   :  { %s215_s11 = spop %214 }
 0x42a   :  { %s217_s13 = spop %216 }
 0x42b   :  { %s180_s14 = sadd.f32 %s217_s13, %s215_s11 }
 0x42d   :  { %s182_s15 = ssub.f32 %s180_s14, %s181_s12 }
 0x42f   :  { %s183_s16 = smul.f32 0.0625, %s182_s15 }
 0x431   :  { %185 = sst [smem:[#allocation6]] %s183_s16 }
 0x432 PF:  { %s258_s19 = scalar_lea.hbm %s375_s2, 16 }
 0x433   :  { %p259_p11 = scmp.ne.s32.totalorder %s375_s2, %s258_s19  ;;  %p262_p12 = scmp.lt.u32.totalorder %s258_s19, %s375_s2 }
 0x435   :  { %p264_p13 = pnand %p262_p12, %p259_p11 }
 0x437   :  { %267 = shalt.err (!%p264_p13)
}
 0x438   :  { %s273_s0 = smov [#allocation6]  }
 0x439   :  { %193 = dma.smem_to_hbm %s273_s0, 16, %s375_s2, [#allocation5]  }
 0x43a   :  { %270 = dma.done.wait [#allocation5], 16  }
 0x43b   :  { %271 = vsyncadd [#allocation5], 4294967280 }
 0x43c   :  { %197 = sfence }
 0x43d   :  { %198 = vsyncpa [#allocation4], 1 }
 0x43e   :  { %199 = vsyncpa [#allocation5], 1 }

</bundles_post_ra>
